<compile_context>
chip_gen: v5e
topology: v5e:2x2
jax: 0.10.0
libtpu: 0.0.40
codegen_flags: <defaults>
</compile_context>

<pallas_src>
import functools

import jax
import jax.numpy as jnp
from jax.experimental import pallas as pl
from jax.experimental.pallas import tpu as pltpu

LAT_INIT_SCALE = 1e-10


def _round_up(x, m):
    return (x + m - 1) // m * m


def _vmem_capacity_bytes():
    # Conservative fallback (v7x-sized) if the query is unavailable.
    try:
        info = pltpu.get_tpu_info()
        return int(getattr(info, "vmem_capacity_bytes", 64 << 20))
    except Exception:
        return 64 << 20


def _expr_logmean_kernel(act_ref, w_ref, o_ref):
    # Single fused MXU matmul: K already carries lat / cc / batch / const / log_sf.
    o_ref[...] = jnp.dot(
        act_ref[...], w_ref[...],
        preferred_element_type=jnp.float32,
        precision=jax.lax.Precision.HIGHEST,
    ).astype(o_ref.dtype)


@functools.partial(jax.jit, static_argnames=("tm", "tg", "out_dtype"))
def expr_logmean_linear_forward(lat_coord, cc_mat, size_factor, batch_mat,
                                lat_coef, cc_coef, const, batch_coef,
                                *, tm=512, tg=2048, out_dtype=jnp.float32):
    n_cell, ndim_lat = lat_coord.shape
    n_gene = lat_coef.shape[1]
    n_batch = batch_coef.shape[0]

    f32 = jnp.float32
    k_dim = ndim_lat + 2 + n_batch + 2          # + ones col, + log_sf col
    k_pad = _round_up(k_dim, 8)

    # ---- Fused activations / weights, built in ONE concatenate each ----------
    act_parts = [
        lat_coord.astype(f32),
        cc_mat.astype(f32),
        batch_mat.astype(f32),
        jnp.ones((n_cell, 1), f32),                              # -> const row
        jnp.log(size_factor.astype(f32)).reshape(n_cell, 1),     # -> ones row
    ]
    w_parts = [
        lat_coef.astype(f32),
        cc_coef.astype(f32),
        batch_coef.astype(f32),
        const.astype(f32),
        jnp.ones((1, n_gene), f32),
    ]
    if k_pad > k_dim:
        act_parts.append(jnp.zeros((n_cell, k_pad - k_dim), f32))
        w_parts.append(jnp.zeros((k_pad - k_dim, n_gene), f32))
    act_p = jnp.concatenate(act_parts, axis=1)                   # (n_cell, k_pad)
    w_p = jnp.concatenate(w_parts, axis=0)                       # (k_pad, n_gene)

    # ---- Tile selection: (8,128)-aligned, clamped, kept >=2 steps per axis ----
    tm_eff = _round_up(min(tm, _round_up(n_cell, 8)), 8)
    tg_eff = _round_up(min(tg, _round_up(n_gene, 128)), 128)
    # Keep >=2 grid steps per parallel axis when possible so both v7x cores work.
    while -(-n_gene // tg_eff) < 2 and tg_eff > 128:
        tg_eff = _round_up(tg_eff // 2, 128)
    while -(-n_cell // tm_eff) < 2 and tm_eff > 8:
        tm_eff = _round_up(tm_eff // 2, 8)

    grid = (pl.cdiv(n_gene, tg_eff), pl.cdiv(n_cell, tm_eff))    # genes OUTER

    # ---- Generation-aware VMEM budget (double-buffered tiles + headroom) -----
    tile_bytes = 4 * (tm_eff * k_pad + k_pad * tg_eff + tm_eff * tg_eff)
    vmem_cap = _vmem_capacity_bytes()
    vmem_limit = min(2 * tile_bytes + (8 << 20), vmem_cap * 3 // 4)

    out_bytes = n_cell * n_gene * jnp.dtype(out_dtype).itemsize
    cost = pl.CostEstimate(
        flops=2 * n_cell * k_pad * n_gene,
        transcendentals=0,
        bytes_accessed=out_bytes + 4 * (grid[0] * n_cell * k_pad + k_pad * n_gene),
    )

    out = pl.pallas_call(
        _expr_logmean_kernel,
        out_shape=jax.ShapeDtypeStruct((n_cell, n_gene), out_dtype),
        grid_spec=pltpu.PrefetchScalarGridSpec(
            num_scalar_prefetch=0,
            grid=grid,
            in_specs=[
                # fused activation tile: varies with the (inner) cell axis only
                pl.BlockSpec((tm_eff, k_pad), lambda gi, ci: (ci, 0)),
                # fused weight slab: constant over the inner cell loop -> fetched
                # once per gene tile (no per-cell-tile re-streaming)
                pl.BlockSpec((k_pad, tg_eff), lambda gi, ci: (0, gi)),
            ],
            out_specs=pl.BlockSpec((tm_eff, tg_eff), lambda gi, ci: (ci, gi)),
        ),
        compiler_params=pltpu.CompilerParams(
            dimension_semantics=("parallel", "parallel"),
            vmem_limit_bytes=vmem_limit,
        ),
        cost_estimate=cost,
    )(act_p, w_p)

    return out


if __name__ == "__main__":
    # Small, module-consistent shapes.
    n_cell, ndim_lat, n_gene, n_batch = 8, 16, 128, 4

    key = jax.random.PRNGKey(0)
    k = jax.random.split(key, 6)

    # Deterministic parameter init mirroring the PyTorch __init__.
    lat_coef = (jax.random.normal(k[0], (ndim_lat, n_gene), jnp.float32)
                * LAT_INIT_SCALE)
    cc_coef = jnp.zeros((2, n_gene), jnp.float32)
    const = jnp.zeros((1, n_gene), jnp.float32)
    batch_coef = jnp.zeros((n_batch, n_gene), jnp.float32)

    # Inputs.
    lat_coord = jax.random.normal(k[1], (n_cell, ndim_lat), jnp.float32)
    cc_mat = jax.random.normal(k[2], (n_cell, 2), jnp.float32)
    size_factor = jax.random.uniform(k[3], (n_cell,), jnp.float32,
                                     minval=0.5, maxval=2.0)
    batch_mat = jax.random.normal(k[4], (n_cell, n_batch), jnp.float32)

    out = expr_logmean_linear_forward(
        lat_coord, cc_mat, size_factor, batch_mat,
        lat_coef, cc_coef, const, batch_coef)
    out = jax.block_until_ready(out)

    # Reference check in plain JAX.
    ref = (lat_coord @ lat_coef
           + cc_mat @ cc_coef
           + jnp.log(size_factor)[:, None]
           + jnp.broadcast_to(const, (n_cell, n_gene))
           + batch_mat @ batch_coef)
    assert out.shape == (n_cell, n_gene)
    assert jnp.allclose(out, ref, atol=1e-5, rtol=1e-5)

    print("KERNEL_OK")
</pallas_src>

<mosaic_0001>
module attributes {stable_mosaic.version = 11 : i64} {
  func.func @_expr_logmean_kernel(%arg0: i32, %arg1: i32, %arg2: memref<8x24xf32, #tpu.memory_space<vmem>>, %arg3: memref<24x128xf32, #tpu.memory_space<vmem>>, %arg4: memref<8x128xf32, #tpu.memory_space<vmem>>) attributes {dimension_semantics = [#tpu.dimension_semantics<parallel>, #tpu.dimension_semantics<parallel>], iteration_bounds = array<i64: 1, 1>, scalar_prefetch = 0 : i64, scratch_operands = 0 : i64, tpu.core_type = #tpu.core_type<tc>, window_params = [{transform_indices = @transform_0, window_bounds = array<i64: 8, 24>}, {transform_indices = @transform_1, window_bounds = array<i64: 24, 128>}, {transform_indices = @transform_2, window_bounds = array<i64: 8, 128>}]} {
    %c0 = arith.constant 0 : index
    %c0_0 = arith.constant 0 : index
    %0 = vector.load %arg2[%c0, %c0_0] : memref<8x24xf32, #tpu.memory_space<vmem>>, vector<8x24xf32>
    %c0_1 = arith.constant 0 : index
    %c0_2 = arith.constant 0 : index
    %1 = vector.load %arg3[%c0_1, %c0_2] : memref<24x128xf32, #tpu.memory_space<vmem>>, vector<24x128xf32>
    %cst = arith.constant dense<0.000000e+00> : vector<8x128xf32>
    %2 = tpu.matmul %0, %1, %cst {dimension_numbers = #tpu.dot_dimension_numbers<[1], [0], [0], [1], [0, 0, 1, 1], [], []>, precision = #tpu.contract_precision<fp32>} : vector<8x24xf32>, vector<24x128xf32>, vector<8x128xf32> -> vector<8x128xf32>
    %c0_3 = arith.constant 0 : index
    %c0_4 = arith.constant 0 : index
    %3 = vector.load %arg4[%c0_3, %c0_4] : memref<8x128xf32, #tpu.memory_space<vmem>>, vector<8x128xf32>
    tpu.vector_store %arg4[%c0_3, %c0_4], %2 {strides = array<i32>} : memref<8x128xf32, #tpu.memory_space<vmem>>, vector<8x128xf32>,
    return
  }
  func.func @transform_0(%arg0: i32, %arg1: i32) -> (i32, i32) {
    %c0_i32 = arith.constant 0 : i32
    %c0_i32_0 = arith.constant 0 : i32
    return %arg1, %c0_i32 : i32, i32
  }
  func.func @transform_1(%arg0: i32, %arg1: i32) -> (i32, i32) {
    %c0_i32 = arith.constant 0 : i32
    %c0_i32_0 = arith.constant 0 : i32
    return %c0_i32, %arg0 : i32, i32
  }
  func.func @transform_2(%arg0: i32, %arg1: i32) -> (i32, i32) {
    %c0_i32 = arith.constant 0 : i32
    return %arg1, %arg0 : i32, i32
  }
}

</mosaic_0001>

<bundles_post_ra>
// kernel: expr_logmean_linear_forward.1
= control target key start
LH: loop header
LB: loop body
LE: loop exit
PB: predicated region body
PF: predicated region fallthrough
CT: control target
= control target key end

     0   :  { %vm16_vm0 = vcmask 195584   ;;  %s267_s0 = inlined_call_operand.vmem [shape: f32[8,24], index: 0, kind: input, shape index: {}]   ;;  %s268_s1 = inlined_call_operand.vmem [shape: f32[24,128], index: 1, kind: input, shape index: {}]   ;;  %s269_s2 = inlined_call_operand.hbm [shape: f32[8,128], index: 2, kind: output, shape index: {}]  }
   0x1   :  { %v15_v0 = vld [vmem:[%s268_s1 + $0x10] sm:$0xff]  ;;  %v14_v1 = vld [vmem:[%s268_s1 + $0x8] sm:$0xff]  ;;  %v13_v2 = vld [vmem:[%s268_s1] sm:$0xff] }
   0x2   :  { %v33_v3 = vand.u32 4294901760, %v15_v0  ;;  %v35_v4 = vand.u32 4294901760, %v14_v1  ;;  %v37_v5 = vand.u32 4294901760, %v13_v2  ;;  %v12_v6 = vld [vmem:[%s267_s0] sm:$0xff] }
   0x3   :  { %7 = vsyncpa [#allocation3], 0  ;;  %v18_v7 = vsel %vm16_vm0, %v12_v6, 0  ;;  %s236_s0 = smov [#allocation2]   ;;  %s200_s19 = sshll.u32 %s269_s2, 4  ;;  %s201_s19 = int_to_ptr.hbm [resolvable:$true] %s200_s19 }
   0x4   :  { %v62_v8 = vsub.f32 %v15_v0, %v33_v3  ;;  %34 = vmatpush.msra.mxu0 %v33_v3  ;;  %v68_v9 = vsub.f32 %v14_v1, %v35_v4  ;;  %126 = vmatpush.msra.mxu3 %v33_v3  ;;  %v74_v10 = vsub.f32 %v13_v2, %v37_v5  ;;  %v39_v11 = vand.u32 4294901760, %v18_v7  ;;  %s198_s1 = sshll.u32 %s236_s0, 4  ;;  %s199_s1 = int_to_ptr.vmem [resolvable:$true] %s198_s1 }
   0x6   :  { %99 = vmatpush.msra.mxu2 %v62_v8  ;;  %36 = vmatpush.msra.mxu0 %v35_v4  ;;  %v63_v12 = vand.u32 4294901760, %v62_v8  ;;  %v40_v13 = vsub.f32 %v18_v7, %v39_v11  ;;  %v69_v14 = vand.u32 4294901760, %v68_v9  ;;  %v75_v15 = vand.u32 4294901760, %v74_v10 }
   0x7   :  { %128 = vmatpush.msra.mxu3 %v35_v4 }
   0x8   :  { %102 = vmatpush.msra.mxu2 %v68_v9  ;;  %v64_v16 = vsub.f32 %v62_v8, %v63_v12  ;;  %38 = vmatpush.msra.mxu0 %v37_v5  ;;  %v70_v17 = vsub.f32 %v68_v9, %v69_v14  ;;  %v41_v18 = vand.u32 4294901760, %v40_v13  ;;  %v76_v19 = vsub.f32 %v74_v10, %v75_v15 }
   0x9   :  { %130 = vmatpush.msra.mxu3 %v37_v5 }
   0xa   :  { %154 = vmatpush.msrb.mxu0 %v63_v12  ;;  %v65_v20 = vand.u32 4294901760, %v64_v16  ;;  %105 = vmatpush.msra.mxu2 %v74_v10  ;;  %v71_v21 = vand.u32 4294901760, %v70_v17  ;;  %v42_v22 = vsub.f32 %v40_v13, %v41_v18  ;;  %v77_v24 = vand.u32 4294901760, %v76_v19 }
   0xb   :  { %134 = vmatmul.f32.vlgmr.msra.gmra.mxu3 %v41_v18  ;;  %108 = vmatmul.f32.vlgmr.msra.gmra.mxu2 %v40_v13 }
   0xc   :  { %158 = vmatpush.msrb.mxu0 %v69_v14  ;;  %66 = vmatpush.msra.mxu1 %v65_v20  ;;  %v43_v23 = vand.u32 4294901760, %v42_v22 }
   0xe   :  { %162 = vmatpush.msrb.mxu0 %v75_v15  ;;  %72 = vmatpush.msra.mxu1 %v71_v21 }
   0xf   :  { %44 = vmatmul.f32.vlgmr.msra.gmra.mxu0 %v43_v23 }
  0x10   :  { %78 = vmatpush.msra.mxu1 %v77_v24 }
  0x11   :  { %80 = vmatmul.f32.vlgmr.msra.gmra.mxu1 %v39_v11 }
  0x12   :  { %182 = vmatpush.msrb.mxu1 %v33_v3 }
  0x14   :  { %184 = vmatpush.msrb.mxu1 %v35_v4 }
  0x16   :  { %186 = vmatpush.msrb.mxu1 %v37_v5 }
  0x17   :  { %164 = vmatmul.f32.vlgmr.msrb.gmra.mxu0 %v39_v11 }
  0x19   :  { %188 = vmatmul.f32.vlgmr.msrb.gmra.mxu1 %v39_v11 }
  0x8c   :  { %v45_v25 = vpop.f32.mrf.mxu0 }
  0x8e   :  { %v81_v26 = vpop.f32.mrf.mxu1  ;;  %v109_v27 = vpop.f32.mrf.mxu2 }
  0x8f   :  { %v82_v28 = vadd.f32 %v81_v26, %v45_v25  ;;  %v135_v29 = vpop.f32.mrf.mxu3 }
  0x91   :  { %v110_v30 = vadd.f32 %v109_v27, %v82_v28 }
  0x93   :  { %v136_v31 = vadd.f32 %v135_v29, %v110_v30 }
  0x94   :  { %v165_v32 = vpop.f32.mrf.mxu0 }
  0x95   :  { %v166_v33 = vadd.f32 %v165_v32, %v136_v31 }
  0x96   :  { %v189_v34 = vpop.f32.mrf.mxu1 }
  0x97   :  { %v190_v35 = vadd.f32 %v189_v34, %v166_v33 }
  0x99   :  { %192 = vst [vmem:[#allocation2] sm:$0xff] %v190_v35 }
  0x9a   :  { %203 = dma.vmem_to_hbm [thread:$0]  %s199_s1, 128, %s201_s19, [#allocation3]  }
  0x9b   :  { %234 = dma.done.wait [#allocation3], 128  }
  0x9c   :  { %235 = vsyncadd [#allocation3], 4294967168 }
  0x9d   :  { %208 = vsyncpa [#allocation3], 1 }

</bundles_post_ra>
